<compile_context>
chip_gen: v7x
topology: tpu7x:2x2x1
jax: 0.10.0
libtpu: 0.0.40
codegen_flags: <defaults>
</compile_context>

<pallas_src>
import functools
import math

import jax
import jax.numpy as jnp
from jax.experimental import pallas as pl
from jax.experimental.pallas import tpu as pltpu

_VMEM_LIMIT = 48 * 1024 * 1024   # safe scoped-VMEM request on v5e/v6e/v7x
_LN_EPS = 1e-5


# --------------------------------------------------------------- tiling utils

def _round_up(x, m):
    return ((x + m - 1) // m) * m


def _tile_dim(dim, target, align):
    """(tile, padded_dim).  Full dim if it fits one tile (full-dim blocks are
    always legal); otherwise an `align`-multiple tile with the dim padded up
    to a tile multiple so every block is aligned and every store unmasked."""
    if dim <= target:
        return dim, dim
    tile = max(align, (target // align) * align)
    return tile, _round_up(dim, tile)


def _pad2(a, rows, cols):
    pr, pc = rows - a.shape[0], cols - a.shape[1]
    if pr == 0 and pc == 0:
        return a
    return jnp.pad(a, ((0, pr), (0, pc)))


def _pad_seq(a, length):
    if a.shape[1] == length:
        return a
    return jnp.pad(a, ((0, 0), (0, length - a.shape[1]), (0, 0)))


def _head_group_width(d_model, nheads):
    """Feature-block (lane) width for the attention head grid axis."""
    dh = d_model // nheads
    if dh % 128 == 0:
        return dh                       # one head per block, already lane-dense
    if d_model % 128 == 0:
        g = 128 // math.gcd(128, dh)    # heads per group -> 128-multiple lanes
        if nheads % g == 0:
            return g * dh
    return d_model                      # tiny/toy dims: all heads in one block


# ------------------------------------------------------------------- kernels

def _linear_kernel(x_ref, w_ref, b_ref, o_ref, acc_ref, *, activation):
    """Tiled  o = act(x @ W + b);  K is the last ("arbitrary") grid axis."""
    @pl.when(pl.program_id(2) == 0)
    def _init():
        acc_ref[...] = jnp.zeros_like(acc_ref)

    acc_ref[...] += jnp.dot(x_ref[...], w_ref[...],
                            preferred_element_type=jnp.float32)

    @pl.when(pl.program_id(2) == pl.num_programs(2) - 1)
    def _finalize():
        out = acc_ref[...] + b_ref[...].astype(jnp.float32)
        if activation == "relu":
            out = jnp.maximum(out, 0.0)
        o_ref[...] = out.astype(o_ref.dtype)


def _layer_norm_f32(x, g_ref, b_ref):
    mean = jnp.mean(x, axis=-1, keepdims=True)
    var = jnp.mean(jnp.square(x - mean), axis=-1, keepdims=True)
    inv = jax.lax.rsqrt(var + _LN_EPS)
    return ((x - mean) * inv * g_ref[...].astype(jnp.float32)
            + b_ref[...].astype(jnp.float32))


def _linear_res_ln_kernel(x_ref, w_ref, b_ref, r_ref, g_ref, bt_ref,
                          o_ref, acc_ref):
    """o = LayerNorm(x @ W + b + residual) * gamma + beta  (N untiled = d_model)."""
    @pl.when(pl.program_id(1) == 0)
    def _init():
        acc_ref[...] = jnp.zeros_like(acc_ref)

    acc_ref[...] += jnp.dot(x_ref[...], w_ref[...],
                            preferred_element_type=jnp.float32)

    @pl.when(pl.program_id(1) == pl.num_programs(1) - 1)
    def _finalize():
        x = (acc_ref[...] + b_ref[...].astype(jnp.float32)
             + r_ref[...].astype(jnp.float32))
        o_ref[...] = _layer_norm_f32(x, g_ref, bt_ref).astype(o_ref.dtype)


def _ffn_res_ln_kernel(x_ref, w1_ref, b1_ref, w2_ref, b2_ref, g_ref, bt_ref,
                       o_ref, acc_ref):
    """o = LayerNorm(relu(x@W1 + b1)@W2 + b2 + x) * gamma + beta.
    d_ff is the streamed reduction axis; the ReLU intermediate stays in VMEM."""
    @pl.when(pl.program_id(1) == 0)
    def _init():
        acc_ref[...] = jnp.zeros_like(acc_ref)

    h = jnp.dot(x_ref[...], w1_ref[...], preferred_element_type=jnp.float32)
    h = jnp.maximum(h + b1_ref[...].astype(jnp.float32), 0.0)
    acc_ref[...] += jnp.dot(h.astype(x_ref.dtype), w2_ref[...],
                            preferred_element_type=jnp.float32)

    @pl.when(pl.program_id(1) == pl.num_programs(1) - 1)
    def _finalize():
        x = (acc_ref[...] + b2_ref[...].astype(jnp.float32)
             + x_ref[...].astype(jnp.float32))          # residual == input rows
        o_ref[...] = _layer_norm_f32(x, g_ref, bt_ref).astype(o_ref.dtype)


def _flash_attn_kernel(q_ref, k_ref, v_ref, kk_ref, o_ref,
                       m_ref, l_ref, acc_ref, *, hpg, dh, scale, causal):
    """Flash attention for one head-group block.

    Blocks: q/o (1, tq, dg), k/v (1, tk, dg), key-keep (1, 1, tk), dg = hpg*dh.
    Grid  : (batch*head_groups, q_tiles, kv_tiles); kv is the reduction axis.
    Scratch: m/l (hpg, tq, 1), acc (hpg, tq, dh) — all f32.
    hpg == 1 whenever head_dim is a 128-multiple (fully lane-dense path)."""
    qi = pl.program_id(1)
    ki = pl.program_id(2)
    tq = q_ref.shape[1]
    tk = k_ref.shape[1]

    @pl.when(ki == 0)
    def _init():
        m_ref[...] = jnp.full_like(m_ref, -jnp.inf)
        l_ref[...] = jnp.zeros_like(l_ref)
        acc_ref[...] = jnp.zeros_like(acc_ref)

    def _compute():
        keep = kk_ref[0] > 0.0                                     # (1, tk)
        if causal:
            rows = qi * tq + jax.lax.broadcasted_iota(jnp.int32, (tq, tk), 0)
            cols = ki * tk + jax.lax.broadcasted_iota(jnp.int32, (tq, tk), 1)
            keep = jnp.logical_and(keep, rows >= cols)             # (tq, tk)
        neg = jnp.float32(-1e30)

        # Short static loop only over the (<= 128 / head_dim) heads inside
        # this lane-dense head group; hpg == 1 in the preferred configs.
        for h in range(hpg):
            sl = pl.ds(h * dh, dh) if hpg > 1 else slice(None)
            qh = q_ref[0, :, sl]                                   # (tq, dh)
            kh = k_ref[0, :, sl]                                   # (tk, dh)
            vh = v_ref[0, :, sl]                                   # (tk, dh)

            # QK^T contracting last axes (no explicit K transpose).
            s = jax.lax.dot_general(
                qh, kh, (((1,), (1,)), ((), ())),
                preferred_element_type=jnp.float32) * scale        # (tq, tk)
            s = jnp.where(keep, s, neg)

            m_prev = m_ref[h]                                      # (tq, 1)
            m_new = jnp.maximum(m_prev, jnp.max(s, axis=-1, keepdims=True))
            alpha = jnp.exp(m_prev - m_new)
            p = jnp.exp(s - m_new)
            l_ref[h] = alpha * l_ref[h] + jnp.sum(p, axis=-1, keepdims=True)
            acc_ref[h] = alpha * acc_ref[h] + jnp.dot(
                p.astype(vh.dtype), vh, preferred_element_type=jnp.float32)
            m_ref[h] = m_new

    if causal:
        # Blocks fully above the diagonal are never computed (and their K/V
        # DMA is avoided via the clamped index_map in the wrapper).
        @pl.when(ki * tk <= qi * tq + (tq - 1))
        def _():
            _compute()
    else:
        _compute()

    @pl.when(ki == pl.num_programs(2) - 1)
    def _finalize():
        inv = pl.reciprocal(jnp.maximum(l_ref[...], 1e-30), approx=True)
        if hpg == 1:
            o_ref[0] = (acc_ref[0] * inv[0]).astype(o_ref.dtype)   # single wide store
        else:
            for h in range(hpg):
                o_ref[0, :, pl.ds(h * dh, dh)] = (acc_ref[h] * inv[h]).astype(o_ref.dtype)


# ------------------------------------------------------------------ wrappers

def linear(x2d, w, b, *, activation=None, out_dtype=None, tm=512, tn=512, tk=512):
    """Tiled/pipelined  x2d @ w + b  (optionally fused ReLU)."""
    M, K = x2d.shape
    N = w.shape[1]
    tm, Mp = _tile_dim(M, tm, 8)
    tn, Np = _tile_dim(N, tn, 128)
    tk, Kp = _tile_dim(K, tk, 128)
    xp = _pad2(x2d, Mp, Kp)
    wp = _pad2(w, Kp, Np)
    bp = _pad2(b.reshape(1, N), 1, Np)
    out_dtype = x2d.dtype if out_dtype is None else out_dtype

    out = pl.pallas_call(
        functools.partial(_linear_kernel, activation=activation),
        out_shape=jax.ShapeDtypeStruct((Mp, Np), out_dtype),
        grid=(Mp // tm, Np // tn, Kp // tk),
        in_specs=[
            pl.BlockSpec((tm, tk), lambda i, j, k: (i, k)),
            pl.BlockSpec((tk, tn), lambda i, j, k: (k, j)),
            pl.BlockSpec((1, tn), lambda i, j, k: (0, j)),
        ],
        out_specs=pl.BlockSpec((tm, tn), lambda i, j, k: (i, j)),
        scratch_shapes=[pltpu.VMEM((tm, tn), jnp.float32)],
        compiler_params=pltpu.CompilerParams(
            dimension_semantics=("parallel", "parallel", "arbitrary"),
            vmem_limit_bytes=_VMEM_LIMIT),
    )(xp, wp, bp)
    if Mp != M or Np != N:
        out = out[:M, :N]
    return out


def linear_res_ln(x3, w, b, residual3, gamma, beta, *, tm=256, tk=512):
    """LayerNorm(x3 @ w + b + residual3) * gamma + beta, fused in one kernel."""
    B, L, K = x3.shape
    N = w.shape[1]
    M = B * L
    tm, Mp = _tile_dim(M, tm, 8)
    tk, Kp = _tile_dim(K, tk, 128)
    xp = _pad2(x3.reshape(M, K), Mp, Kp)
    wp = _pad2(w, Kp, N)
    rp = _pad2(residual3.reshape(M, N), Mp, N)

    out = pl.pallas_call(
        _linear_res_ln_kernel,
        out_shape=jax.ShapeDtypeStruct((Mp, N), x3.dtype),
        grid=(Mp // tm, Kp // tk),
        in_specs=[
            pl.BlockSpec((tm, tk), lambda i, k: (i, k)),
            pl.BlockSpec((tk, N), lambda i, k: (k, 0)),
            pl.BlockSpec((1, N), lambda i, k: (0, 0)),
            pl.BlockSpec((tm, N), lambda i, k: (i, 0)),
            pl.BlockSpec((1, N), lambda i, k: (0, 0)),
            pl.BlockSpec((1, N), lambda i, k: (0, 0)),
        ],
        out_specs=pl.BlockSpec((tm, N), lambda i, k: (i, 0)),
        scratch_shapes=[pltpu.VMEM((tm, N), jnp.float32)],
        compiler_params=pltpu.CompilerParams(
            dimension_semantics=("parallel", "arbitrary"),
            vmem_limit_bytes=_VMEM_LIMIT),
    )(xp, wp, b.reshape(1, N), rp, gamma.reshape(1, N), beta.reshape(1, N))
    out = out[:M] if Mp != M else out
    return out.reshape(B, L, N)


def ffn_res_ln(x3, w1, b1, w2, b2, gamma, beta, *, tm=256, tf=512):
    """LayerNorm(relu(x3 @ w1 + b1) @ w2 + b2 + x3) * gamma + beta.
    The (tm, d_ff) ReLU intermediate never leaves VMEM."""
    B, L, D = x3.shape
    F = w1.shape[1]
    M = B * L
    tm, Mp = _tile_dim(M, tm, 8)
    tf, Fp = _tile_dim(F, tf, 128)
    xp = _pad2(x3.reshape(M, D), Mp, D)
    w1p = _pad2(w1, D, Fp)
    b1p = _pad2(b1.reshape(1, F), 1, Fp)
    w2p = _pad2(w2, Fp, D)

    out = pl.pallas_call(
        _ffn_res_ln_kernel,
        out_shape=jax.ShapeDtypeStruct((Mp, D), x3.dtype),
        grid=(Mp // tm, Fp // tf),
        in_specs=[
            pl.BlockSpec((tm, D), lambda i, f: (i, 0)),   # x (also the residual)
            pl.BlockSpec((D, tf), lambda i, f: (0, f)),   # w1
            pl.BlockSpec((1, tf), lambda i, f: (0, f)),   # b1
            pl.BlockSpec((tf, D), lambda i, f: (f, 0)),   # w2
            pl.BlockSpec((1, D), lambda i, f: (0, 0)),    # b2
            pl.BlockSpec((1, D), lambda i, f: (0, 0)),    # gamma
            pl.BlockSpec((1, D), lambda i, f: (0, 0)),    # beta
        ],
        out_specs=pl.BlockSpec((tm, D), lambda i, f: (i, 0)),
        scratch_shapes=[pltpu.VMEM((tm, D), jnp.float32)],
        compiler_params=pltpu.CompilerParams(
            dimension_semantics=("parallel", "arbitrary"),
            vmem_limit_bytes=_VMEM_LIMIT),
    )(xp, w1p, b1p, w2p, b2.reshape(1, D), gamma.reshape(1, D), beta.reshape(1, D))
    out = out[:M] if Mp != M else out
    return out.reshape(B, L, D)


def flash_attention(q_arr, k_arr, v_arr, q_off, k_off, v_off, key_keep,
                    nheads, d_model, causal, *, tq_target=256, tk_target=256):
    """Flash-style MHA.  q_arr/k_arr/v_arr may be wider fused arrays (e.g. the
    (B, L, 3D) QKV projection); q_off/k_off/v_off are the feature offsets of
    Q/K/V inside them.  Heads are blocked on the grid (lane width dg)."""
    B, Lq = q_arr.shape[0], q_arr.shape[1]
    Lk = k_arr.shape[1]
    dh = d_model // nheads
    dg = _head_group_width(d_model, nheads)
    hpg = dg // dh                      # heads handled inside one block
    G = d_model // dg                   # head-group grid extent
    scale = 1.0 / math.sqrt(dh)

    tq, Lqp = _tile_dim(Lq, tq_target, 8)
    tk, Lkp = _tile_dim(Lk, tk_target, 128)

    qp = _pad_seq(q_arr, Lqp)
    kp = qp if (k_arr is q_arr and Lkp == Lqp) else _pad_seq(k_arr, Lkp)
    if v_arr is k_arr:
        vp = kp
    elif v_arr is q_arr and Lkp == Lqp:
        vp = qp
    else:
        vp = _pad_seq(v_arr, Lkp)
    kk = jnp.pad(key_keep.astype(jnp.float32), ((0, 0), (0, Lkp - Lk)))
    kk = kk.reshape(B, 1, Lkp)

    qb, kb, vb = q_off // dg, k_off // dg, v_off // dg

    if causal:
        def _kv_idx(qi, ki):
            # Clamp to the last KV block intersecting the diagonal for this Q
            # tile: fully-masked steps revisit the resident block (no new DMA).
            return jnp.minimum(ki, (qi * tq + tq - 1) // tk)
    else:
        def _kv_idx(qi, ki):
            return ki

    out = pl.pallas_call(
        functools.partial(_flash_attn_kernel, hpg=hpg, dh=dh, scale=scale,
                          causal=causal),
        out_shape=jax.ShapeDtypeStruct((B, Lqp, d_model), q_arr.dtype),
        grid=(B * G, Lqp // tq, Lkp // tk),
        in_specs=[
            pl.BlockSpec((1, tq, dg),
                         lambda bg, qi, ki: (bg // G, qi, qb + bg % G)),
            pl.BlockSpec((1, tk, dg),
                         lambda bg, qi, ki: (bg // G, _kv_idx(qi, ki), kb + bg % G)),
            pl.BlockSpec((1, tk, dg),
                         lambda bg, qi, ki: (bg // G, _kv_idx(qi, ki), vb + bg % G)),
            pl.BlockSpec((1, 1, tk),
                         lambda bg, qi, ki: (bg // G, 0, _kv_idx(qi, ki))),
        ],
        out_specs=pl.BlockSpec((1, tq, dg),
                               lambda bg, qi, ki: (bg // G, qi, bg % G)),
        scratch_shapes=[
            pltpu.VMEM((hpg, tq, 1), jnp.float32),    # running max
            pltpu.VMEM((hpg, tq, 1), jnp.float32),    # running sum
            pltpu.VMEM((hpg, tq, dh), jnp.float32),   # output accumulator
        ],
        compiler_params=pltpu.CompilerParams(
            dimension_semantics=("parallel", "parallel", "arbitrary"),
            vmem_limit_bytes=_VMEM_LIMIT),
    )(qp, kp, vp, kk)
    return out[:, :Lq, :] if Lqp != Lq else out


def _mha_self(p, x, key_keep, causal, nheads):
    B, L, D = x.shape
    qkv = linear(x.reshape(B * L, D), p["w_qkv"], p["b_qkv"]).reshape(B, L, 3 * D)
    if _head_group_width(D, nheads) % 128 == 0:
        # Fused QKV goes straight in; Q/K/V are selected by feature-axis block
        # index in the BlockSpecs (no XLA slice / extra HBM traffic).
        return flash_attention(qkv, qkv, qkv, 0, D, 2 * D, key_keep, nheads, D, causal)
    q, k, v = qkv[..., :D], qkv[..., D:2 * D], qkv[..., 2 * D:]
    return flash_attention(q, k, v, 0, 0, 0, key_keep, nheads, D, causal)


def _mha_cross(p, x, enc_out, key_keep, nheads):
    B, Lq, D = x.shape
    Lk = enc_out.shape[1]
    q = linear(x.reshape(B * Lq, D), p["wq"], p["bq"]).reshape(B, Lq, D)
    kv = linear(enc_out.reshape(B * Lk, D), p["w_kv"], p["b_kv"]).reshape(B, Lk, 2 * D)
    if _head_group_width(D, nheads) % 128 == 0:
        return flash_attention(q, kv, kv, 0, 0, D, key_keep, nheads, D, False)
    k, v = kv[..., :D], kv[..., D:]
    return flash_attention(q, k, v, 0, 0, 0, key_keep, nheads, D, False)


# ------------------------------------------------------------- parameter init

def _w(key, shape, scale=0.02):
    return (scale * jax.random.normal(key, shape, dtype=jnp.float32)).astype(jnp.bfloat16)


def _init_ln(d_model):
    return jnp.ones((d_model,), jnp.float32), jnp.zeros((d_model,), jnp.float32)


def _init_self_attn(key, d_model):
    k1, k2 = jax.random.split(key)
    return {
        "w_qkv": _w(k1, (d_model, 3 * d_model)),
        "b_qkv": jnp.zeros((3 * d_model,), jnp.float32),
        "wo": _w(k2, (d_model, d_model)),
        "bo": jnp.zeros((d_model,), jnp.float32),
    }


def _init_cross_attn(key, d_model):
    k1, k2, k3 = jax.random.split(key, 3)
    return {
        "wq": _w(k1, (d_model, d_model)), "bq": jnp.zeros((d_model,), jnp.float32),
        "w_kv": _w(k2, (d_model, 2 * d_model)), "b_kv": jnp.zeros((2 * d_model,), jnp.float32),
        "wo": _w(k3, (d_model, d_model)), "bo": jnp.zeros((d_model,), jnp.float32),
    }


def _init_enc_layer(key, d_model, d_ff):
    ks = jax.random.split(key, 3)
    g1, b1 = _init_ln(d_model)
    g2, b2 = _init_ln(d_model)
    return {
        "attn": _init_self_attn(ks[0], d_model),
        "ln1_g": g1, "ln1_b": b1, "ln2_g": g2, "ln2_b": b2,
        "w1": _w(ks[1], (d_model, d_ff)), "b1": jnp.zeros((d_ff,), jnp.float32),
        "w2": _w(ks[2], (d_ff, d_model)), "b2": jnp.zeros((d_model,), jnp.float32),
    }


def _init_dec_layer(key, d_model, d_ff):
    ks = jax.random.split(key, 4)
    gs, bs = _init_ln(d_model)
    g1, b1 = _init_ln(d_model)
    g2, b2 = _init_ln(d_model)
    return {
        "self_attn": _init_self_attn(ks[0], d_model),
        "cross_attn": _init_cross_attn(ks[1], d_model),
        "ln_self_g": gs, "ln_self_b": bs,
        "ln1_g": g1, "ln1_b": b1, "ln2_g": g2, "ln2_b": b2,
        "w1": _w(ks[2], (d_model, d_ff)), "b1": jnp.zeros((d_ff,), jnp.float32),
        "w2": _w(ks[3], (d_ff, d_model)), "b2": jnp.zeros((d_model,), jnp.float32),
    }


def init_transformer_params(key, src_vocab, trg_vocab, d_model, d_ff, nlayers, max_len):
    k_enc_emb, k_enc_pos, k_dec_emb, k_dec_pos, k_fc, k_rest = jax.random.split(key, 6)
    k_enc_layers = jax.random.split(jax.random.fold_in(k_rest, 0), nlayers)
    k_dec_layers = jax.random.split(jax.random.fold_in(k_rest, 1), nlayers)
    return {
        "encoder": {
            "tok_emb": _w(k_enc_emb, (src_vocab, d_model)),
            "pos_emb": _w(k_enc_pos, (max_len, d_model)),
            "layers": [_init_enc_layer(k, d_model, d_ff) for k in k_enc_layers],
        },
        "decoder": {
            "tok_emb": _w(k_dec_emb, (trg_vocab, d_model)),
            "pos_emb": _w(k_dec_pos, (max_len, d_model)),
            "layers": [_init_dec_layer(k, d_model, d_ff) for k in k_dec_layers],
            "fc_w": _w(k_fc, (d_model, trg_vocab)),
            "fc_b": jnp.zeros((trg_vocab,), jnp.float32),
        },
    }


# ------------------------------------------------------------------- forward

def encoder_forward(params, src, src_key_keep, nheads):
    B, L = src.shape
    # Token/positional embedding gathers stay in XLA (cheap table lookups).
    x = params["tok_emb"][src] + params["pos_emb"][:L][None, :, :]
    for lp in params["layers"]:
        ctx = _mha_self(lp["attn"], x, src_key_keep, False, nheads)
        x = linear_res_ln(ctx, lp["attn"]["wo"], lp["attn"]["bo"], x,
                          lp["ln1_g"], lp["ln1_b"])
        x = ffn_res_ln(x, lp["w1"], lp["b1"], lp["w2"], lp["b2"],
                       lp["ln2_g"], lp["ln2_b"])
    return x


def decoder_forward(params, trg, enc_out, src_key_keep, nheads):
    B, L = trg.shape
    D = params["tok_emb"].shape[1]
    x = params["tok_emb"][trg] + params["pos_emb"][:L][None, :, :]
    all_keep = jnp.ones((B, L), jnp.float32)  # trg mask is causal-only in the reference
    for lp in params["layers"]:
        sa = _mha_self(lp["self_attn"], x, all_keep, True, nheads)
        q = linear_res_ln(sa, lp["self_attn"]["wo"], lp["self_attn"]["bo"], x,
                          lp["ln_self_g"], lp["ln_self_b"])
        ca = _mha_cross(lp["cross_attn"], q, enc_out, src_key_keep, nheads)
        x2 = linear_res_ln(ca, lp["cross_attn"]["wo"], lp["cross_attn"]["bo"], q,
                           lp["ln1_g"], lp["ln1_b"])
        x = ffn_res_ln(x2, lp["w1"], lp["b1"], lp["w2"], lp["b2"],
                       lp["ln2_g"], lp["ln2_b"])
    logits = linear(x.reshape(B * L, D), params["fc_w"], params["fc_b"],
                    out_dtype=jnp.float32)
    return logits.reshape(B, L, -1)


def transformer_forward(params, src, trg, src_pad_idx, nheads):
    # make_src_mask: (src != pad) over key positions; applied in-kernel from
    # this tiny per-key vector (the dense (B,Lq,Lk) mask is never built).
    src_key_keep = (src != src_pad_idx).astype(jnp.float32)  # (B, Lsrc)
    enc_out = encoder_forward(params["encoder"], src, src_key_keep, nheads)
    return decoder_forward(params["decoder"], trg, enc_out, src_key_keep, nheads)


# ----------------------------------------------------------------------- main

if __name__ == "__main__":
    # Small, shape-consistent configuration.
    src_vocab_size, trg_vocab_size = 20, 22
    src_pad_idx, trg_pad_idx = 0, 0
    nlayers, d_model, nheads, d_feedforward, max_len = 2, 32, 4, 64, 16
    B, Lsrc, Ltrg = 2, 8, 8

    key = jax.random.PRNGKey(0)
    k_params, k_src, k_trg = jax.random.split(key, 3)

    params = init_transformer_params(
        k_params, src_vocab_size, trg_vocab_size, d_model, d_feedforward, nlayers, max_len)

    src = jax.random.randint(k_src, (B, Lsrc), 1, src_vocab_size, dtype=jnp.int32)
    src = src.at[0, -2:].set(src_pad_idx)   # exercise the padding mask
    trg = jax.random.randint(k_trg, (B, Ltrg), 1, trg_vocab_size, dtype=jnp.int32)

    out = transformer_forward(params, src, trg, src_pad_idx, nheads)
    out = jax.block_until_ready(out)
    assert out.shape == (B, Ltrg, trg_vocab_size)
    assert jnp.all(jnp.isfinite(out))
    print("KERNEL_OK")
</pallas_src>

<mosaic_0001>
module attributes {stable_mosaic.version = 11 : i64} {
  func.func @_linear_kernel(%arg0: i32, %arg1: i32, %arg2: i32, %arg3: memref<16x32xbf16, #tpu.memory_space<vmem>>, %arg4: memref<32x96xbf16, #tpu.memory_space<vmem>>, %arg5: memref<1x96xf32, #tpu.memory_space<vmem>>, %arg6: memref<16x96xbf16, #tpu.memory_space<vmem>>, %arg7: memref<16x96xf32, #tpu.memory_space<vmem>>) attributes {dimension_semantics = [#tpu.dimension_semantics<parallel>, #tpu.dimension_semantics<parallel>, #tpu.dimension_semantics<arbitrary>], iteration_bounds = array<i64: 1, 1, 1>, scalar_prefetch = 0 : i64, scratch_operands = 1 : i64, tpu.core_type = #tpu.core_type<tc>, window_params = [{transform_indices = @transform_0, window_bounds = array<i64: 16, 32>}, {transform_indices = @transform_1, window_bounds = array<i64: 32, 96>}, {transform_indices = @transform_2, window_bounds = array<i64: 1, 96>}, {transform_indices = @transform_3, window_bounds = array<i64: 16, 96>}]} {
    %c0_i32 = arith.constant 0 : i32
    %0 = arith.cmpi eq, %arg2, %c0_i32 : i32
    %1 = arith.extui %0 : i1 to i32
    %c0_i32_0 = arith.constant 0 : i32
    %2 = arith.cmpi ne, %1, %c0_i32_0 : i32
    scf.if %2 {
      %cst_10 = arith.constant 0.000000e+00 : f32
      %12 = vector.broadcast %cst_10 : f32 to vector<16x96xf32>
      %c0_11 = arith.constant 0 : index
      %c0_12 = arith.constant 0 : index
      %13 = vector.load %arg7[%c0_11, %c0_12] : memref<16x96xf32, #tpu.memory_space<vmem>>, vector<16x96xf32>
      tpu.vector_store %arg7[%c0_11, %c0_12], %12 {strides = array<i32>} : memref<16x96xf32, #tpu.memory_space<vmem>>, vector<16x96xf32>,
    } else {
    }
    %c0 = arith.constant 0 : index
    %c0_1 = arith.constant 0 : index
    %3 = vector.load %arg7[%c0, %c0_1] : memref<16x96xf32, #tpu.memory_space<vmem>>, vector<16x96xf32>
    %c0_2 = arith.constant 0 : index
    %c0_3 = arith.constant 0 : index
    %4 = vector.load %arg3[%c0_2, %c0_3] : memref<16x32xbf16, #tpu.memory_space<vmem>>, vector<16x32xbf16>
    %c0_4 = arith.constant 0 : index
    %c0_5 = arith.constant 0 : index
    %5 = vector.load %arg4[%c0_4, %c0_5] : memref<32x96xbf16, #tpu.memory_space<vmem>>, vector<32x96xbf16>
    %cst = arith.constant dense<0.000000e+00> : vector<16x96xf32>
    %6 = tpu.matmul %4, %5, %cst {dimension_numbers = #tpu.dot_dimension_numbers<[1], [0], [0], [1], [0, 0, 1, 1], [], []>} : vector<16x32xbf16>, vector<32x96xbf16>, vector<16x96xf32> -> vector<16x96xf32>
    %7 = arith.addf %3, %6 : vector<16x96xf32>
    %c0_6 = arith.constant 0 : index
    %c0_7 = arith.constant 0 : index
    %8 = vector.load %arg7[%c0_6, %c0_7] : memref<16x96xf32, #tpu.memory_space<vmem>>, vector<16x96xf32>
    tpu.vector_store %arg7[%c0_6, %c0_7], %7 {strides = array<i32>} : memref<16x96xf32, #tpu.memory_space<vmem>>, vector<16x96xf32>,
    %c0_i32_8 = arith.constant 0 : i32
    %9 = arith.cmpi eq, %arg2, %c0_i32_8 : i32
    %10 = arith.extui %9 : i1 to i32
    %c0_i32_9 = arith.constant 0 : i32
    %11 = arith.cmpi ne, %10, %c0_i32_9 : i32
    scf.if %11 {
      %c0_10 = arith.constant 0 : index
      %c0_11 = arith.constant 0 : index
      %12 = vector.load %arg7[%c0_10, %c0_11] : memref<16x96xf32, #tpu.memory_space<vmem>>, vector<16x96xf32>
      %c0_12 = arith.constant 0 : index
      %c0_13 = arith.constant 0 : index
      %13 = vector.load %arg5[%c0_12, %c0_13] : memref<1x96xf32, #tpu.memory_space<vmem>>, vector<1x96xf32>
      %14 = vector.broadcast %13 : vector<1x96xf32> to vector<16x96xf32>
      %15 = arith.addf %12, %14 : vector<16x96xf32>
      %16 = arith.truncf %15 : vector<16x96xf32> to vector<16x96xbf16>
      %c0_14 = arith.constant 0 : index
      %c0_15 = arith.constant 0 : index
      %17 = vector.load %arg6[%c0_14, %c0_15] : memref<16x96xbf16, #tpu.memory_space<vmem>>, vector<16x96xbf16>
      tpu.vector_store %arg6[%c0_14, %c0_15], %16 {strides = array<i32>} : memref<16x96xbf16, #tpu.memory_space<vmem>>, vector<16x96xbf16>,
    } else {
    }
    return
  }
  func.func @transform_0(%arg0: i32, %arg1: i32, %arg2: i32) -> (i32, i32) {
    %c0_i32 = arith.constant 0 : i32
    return %arg0, %arg2 : i32, i32
  }
  func.func @transform_1(%arg0: i32, %arg1: i32, %arg2: i32) -> (i32, i32) {
    %c0_i32 = arith.constant 0 : i32
    return %arg2, %arg1 : i32, i32
  }
  func.func @transform_2(%arg0: i32, %arg1: i32, %arg2: i32) -> (i32, i32) {
    %c0_i32 = arith.constant 0 : i32
    %c0_i32_0 = arith.constant 0 : i32
    return %c0_i32, %arg1 : i32, i32
  }
  func.func @transform_3(%arg0: i32, %arg1: i32, %arg2: i32) -> (i32, i32) {
    %c0_i32 = arith.constant 0 : i32
    return %arg0, %arg1 : i32, i32
  }
}

</mosaic_0001>

<bundles_post_ra>
// kernel: tpu_custom_call.1
= control target key start
LH: loop header
LB: loop body
LE: loop exit
PB: predicated region body
PF: predicated region fallthrough
CT: control target
= control target key end

     0   :  { %8 = vsyncpa [#allocation4], 0  ;;  %s350_s0 = inlined_call_operand.hbm [shape: bf16[16,32], index: 0, kind: input, shape index: {}]   ;;  %s351_s1 = inlined_call_operand.hbm [shape: bf16[32,96], index: 1, kind: input, shape index: {}]   ;;  %s352_s2 = inlined_call_operand.vmem [shape: f32[1,96], index: 2, kind: input, shape index: {}]   ;;  %s353_s3 = inlined_call_operand.hbm [shape: bf16[16,96], index: 3, kind: output, shape index: {}]  }
   0x1   :  { %9 = vsyncpa [#allocation7], 0 }
   0x2   :  { %10 = vsyncpa [#allocation5], 0  ;;  %s271_s12 = smov [#allocation3]   ;;  %s199_s16 = scalar_lea.hbm %s350_s0, 128 }
   0x3   :  { %s16_s13 = sshll.u32 %s271_s12, 4  ;;  %p200_p0 = scmp.ne.s32.totalorder %s350_s0, %s199_s16  ;;  %s17_s13 = int_to_ptr.vmem [resolvable:$true] %s16_s13 }
   0x4   :  { %p203_p1 = scmp.lt.u32.totalorder %s199_s16, %s350_s0 }
   0x6   :  { %p205_p2 = pnand %p203_p1, %p200_p0 }
   0x8   :  { %208 = shalt.err (!%p205_p2)
}
   0x9   :  { %s209_s21 = scalar_lea.vmem %s17_s13, 128  ;;  %p214_p4 = scmp.lt.s32.totalorder %s17_s13, %s17_s13 }
   0xa   :  { %p210_p3 = scmp.ne.s32.totalorder %s17_s13, %s209_s21  ;;  %p215_p5 = scmp.lt.s32.totalorder %s209_s21, %s209_s21 }
   0xc   :  { %p216_p6 = por %p215_p5, %p214_p4 }
   0xe   :  { %p217_p7 = pnand %p216_p6, %p210_p3 }
  0x10   :  { %220 = shalt.err (!%p217_p7)
}
  0x11   :  { %s272_s22 = smov 64   ;;  %s273_s23 = smov 4  }
  0x12   :  { %22 = dma.hbm_to_vmem [thread:$0]  %s350_s0, 128, %s17_s13, [#allocation4], %s272_s22, %s272_s22, %s273_s23  }
  0x13   :  { %s274_s26 = smov [#allocation6]   ;;  %s221_s30 = scalar_lea.hbm %s351_s1, 256 }
  0x14   :  { %s28_s27 = sshll.u32 %s274_s26, 4  ;;  %p222_p8 = scmp.ne.s32.totalorder %s351_s1, %s221_s30  ;;  %s29_s27 = int_to_ptr.vmem [resolvable:$true] %s28_s27 }
  0x15   :  { %p225_p9 = scmp.lt.u32.totalorder %s221_s30, %s351_s1 }
  0x17   :  { %p227_p10 = pnand %p225_p9, %p222_p8 }
  0x19   :  { %230 = shalt.err (!%p227_p10)
}
  0x1a   :  { %s231_s8 = scalar_lea.vmem %s29_s27, 256  ;;  %p236_p12 = scmp.lt.s32.totalorder %s29_s27, %s29_s27 }
  0x1b   :  { %p232_p11 = scmp.ne.s32.totalorder %s29_s27, %s231_s8  ;;  %p237_p13 = scmp.lt.s32.totalorder %s231_s8, %s231_s8 }
  0x1d   :  { %p238_p0 = por %p237_p13, %p236_p12 }
  0x1f   :  { %p239_p1 = pnand %p238_p0, %p232_p11 }
  0x21   :  { %242 = shalt.err (!%p239_p1)
}
  0x22   :  { %34 = dma.hbm_to_vmem [thread:$0]  %s351_s1, 256, %s29_s27, [#allocation7], %s272_s22, %s272_s22, %s273_s23  }
  0x23   :  { %265 = dma.done.wait [#allocation4], 128  }
  0x24   :  { %266 = vsyncadd [#allocation4], 4294967168 }
  0x25   :  { %267 = dma.done.wait [#allocation7], 256  }
  0x26   :  { %268 = vsyncadd [#allocation7], 4294967040  ;;  %vm48_vm0 = vcmask 785408   ;;  %v275_v0 = vmov 0.0   ;;  %vm276_vm1 = vmmov 0   ;;  %v196_v1 = vld [vmem:[#allocation6] sm:$0xff]  }
  0x27   :  { %49 = vst.msk [vmem:[#allocation2] sm:$0xff] %vm48_vm0, %v275_v0  ;;  %50 = vst.msk [vmem:[#allocation2 + $0x8] sm:$0xff] %vm48_vm0, %v275_v0  ;;  %181 = vmatprep.subr.bf16.mxu0 %v275_v0  ;;  %185 = vmatprep.mubr.msk.bf16.mxu0 %vm276_vm1, %v275_v0  ;;  %v197_v2 = vld [vmem:[#allocation6 + $0x8] sm:$0xff]   ;;  %v198_v3 = vld [vmem:[#allocation3] sm:$0xff]   ;;  %vm76_vm2 = vcmask 261120   ;;  %vm148_vm3 = vcmask 781312  }
  0x28   :  { %182 = vmatpush3.bf16.msra.mxu0 %v196_v1  ;;  %v173_v12 = vld [vmem:[%s352_s2] ss:$0 sm:$0xff]  ;;  %s277_s11 = smov [#allocation8]  }
  0x29   :  { %183 = vmatprep.subr.bf16.mxu0 %v275_v0  ;;  %s156_s12 = sshll.u32 %s277_s11, 4  ;;  %s157_s12 = int_to_ptr.vmem [resolvable:$true] %s156_s12 }
  0x2a   :  { %s243_s13 = scalar_lea.vmem %s157_s12, 128  ;;  %p248_p3 = scmp.lt.s32.totalorder %s157_s12, %s157_s12 }
  0x2b   :  { %p244_p2 = scmp.ne.s32.totalorder %s157_s12, %s243_s13  ;;  %p249_p4 = scmp.lt.s32.totalorder %s243_s13, %s243_s13 }
  0x2c   :  { %184 = vmatpush3.bf16.msra.mxu0 %v197_v2 }
  0x2d   :  { %p250_p5 = por %p249_p4, %p248_p3 }
  0x2e   :  { %v51_v4 = vld [vmem:[#allocation2] sm:$0xff]  ;;  %v52_v6 = vld [vmem:[#allocation2 + $0x8] sm:$0xff] }
  0x2f   :  { %186 = vmatmul.mubr.msk.bf16.vlgmr.msra.gmra.mrb[0].mxu0 %vm76_vm2, %v198_v3  ;;  %p251_p6 = pnand %p250_p5, %p244_p2 }
 0x102   :  { %v114_v5 = vpop.f32.mrb[0].mxu0 }
 0x103   :  { %v121_v7 = vadd.f32 %v114_v5, %v51_v4  ;;  %v187_v8 = vpop.f32.mrb[1].mxu0 }
 0x104   :  { %v117_v9 = vpop.f32.mrb[2].mxu0 }
 0x105   :  { %124 = vst.msk [vmem:[#allocation2] sm:$0xff] %vm48_vm0, %v121_v7  ;;  %v122_v10 = vadd.f32 %v117_v9, %v52_v6  ;;  %v188_v11 = vpop.f32.mrb[3].mxu0 }
 0x107   :  { %125 = vst.msk [vmem:[#allocation2 + $0x8] sm:$0xff] %vm48_vm0, %v122_v10 }
 0x10c   :  { %v129_v13 = vld [vmem:[#allocation2] sm:$0xff] }
 0x10d   :  { %v138_v14 = vadd.f32 %v173_v12, %v129_v13 }
 0x10e   :  { %v130_v15 = vld [vmem:[#allocation2 + $0x8] sm:$0xff] }
 0x10f   :  { %v139_v16 = vadd.f32 %v173_v12, %v130_v15  ;;  %v176_v17 = vpack.c.bf16 %v138_v14, %v138_v14 }
 0x111   :  { %v177_v18 = vpack.c.bf16 %v139_v16, %v139_v16  ;;  %149 = vst.msk [vmem:[#allocation8] sm:$0xf] %vm148_vm3, %v176_v17 }
 0x113   :  { %150 = vst.msk [vmem:[#allocation8 + $0x4] sm:$0xf] %vm148_vm3, %v177_v18 }
 0x114   :  { %254 = shalt.err (!%p251_p6)
}
 0x115   :  { %s255_s15 = scalar_lea.hbm %s353_s3, 128 }
 0x116   :  { %p256_p7 = scmp.ne.s32.totalorder %s353_s3, %s255_s15  ;;  %p259_p8 = scmp.lt.u32.totalorder %s255_s15, %s353_s3 }
 0x118   :  { %p261_p9 = pnand %p259_p8, %p256_p7 }
 0x11a   :  { %264 = shalt.err (!%p261_p9)
}
 0x11b   :  { %162 = dma.vmem_to_hbm [thread:$0]  %s157_s12, 128, %s353_s3, [#allocation5], %s272_s22, %s272_s22, %s273_s23  }
 0x11c   :  { %269 = dma.done.wait [#allocation5], 128  }
 0x11d   :  { %270 = vsyncadd [#allocation5], 4294967168 }
 0x11e   :  { %166 = vsyncpa [#allocation4], 1 }
 0x11f   :  { %167 = vsyncpa [#allocation7], 1 }
 0x120   :  { %168 = vsyncpa [#allocation5], 1 }

</bundles_post_ra>
